<compile_context>
chip_gen: v5e
topology: v5e:2x2
jax: 0.10.0
libtpu: 0.0.40
codegen_flags: <defaults>
</compile_context>

<pallas_src>
import functools

import jax
import jax.numpy as jnp
from jax.experimental import pallas as pl
from jax.experimental.pallas import tpu as pltpu


def _mlp_kernel(x_ref, wgu_ref, wd_ref, o_ref, acc_ref):
    # x_ref:   (tm, H)      bf16 token tile
    # wgu_ref: (H, 2*ti)    fused [gate_tile | up_tile] weight block (bf16)
    # wd_ref:  (ti, H)      down_proj weight block (transposed, bf16)
    # o_ref:   (tm, H)      output tile (x dtype)
    # acc_ref: (tm, H) f32  VMEM accumulator across the I grid axis
    j = pl.program_id(1)

    @pl.when(j == 0)
    def _():
        acc_ref[...] = jnp.zeros_like(acc_ref)

    ti = wgu_ref.shape[1] // 2
    x = x_ref[...]

    # Fused gate+up projection: one MXU matmul over the [gate_j | up_j] tile.
    gu = jnp.dot(x, wgu_ref[...], preferred_element_type=jnp.float32)  # (tm, 2*ti)
    gate = gu[:, :ti]
    up = gu[:, ti:]

    # SiLU on gate then elementwise product, kept in f32 (VPU/EUP path).
    h = (gate * jax.nn.sigmoid(gate)) * up                             # (tm, ti)

    # Partial down-projection, accumulated across I tiles.
    acc_ref[...] += jnp.dot(h.astype(wd_ref.dtype), wd_ref[...],
                            preferred_element_type=jnp.float32)

    @pl.when(j == pl.num_programs(1) - 1)
    def _():
        o_ref[...] = acc_ref[...].astype(o_ref.dtype)


def _round_up(n, m):
    return (n + m - 1) // m * m


def _pick_ti(I, ti):
    # Largest multiple of 128 that is <= ti and divides I (I % 128 == 0 asserted).
    ti = min(ti, I)
    ti = max(128, (ti // 128) * 128)
    while I % ti:
        ti -= 128
    return ti


def _mlp_forward(x, wgu, wd_t, *, tm, ti):
    B, S, H = x.shape
    I = wd_t.shape[0]
    M = B * S

    # Clamp the token tile for small-batch/decode and pad M up to it.
    tm_eff = min(tm, _round_up(M, 16))
    m_pad = _round_up(M, tm_eff)

    x2d = x.reshape(M, H).astype(wgu.dtype)
    if m_pad != M:
        x2d = jnp.pad(x2d, ((0, m_pad - M), (0, 0)))

    out = pl.pallas_call(
        _mlp_kernel,
        out_shape=jax.ShapeDtypeStruct((m_pad, H), x.dtype),
        grid_spec=pltpu.PrefetchScalarGridSpec(
            num_scalar_prefetch=0,
            grid=(m_pad // tm_eff, I // ti),
            in_specs=[
                pl.BlockSpec((tm_eff, H), lambda i, j: (i, 0)),
                pl.BlockSpec((H, 2 * ti), lambda i, j: (0, j)),
                pl.BlockSpec((ti, H), lambda i, j: (j, 0)),
            ],
            out_specs=pl.BlockSpec((tm_eff, H), lambda i, j: (i, 0)),
            scratch_shapes=[pltpu.VMEM((tm_eff, H), jnp.float32)],
        ),
        compiler_params=pltpu.CompilerParams(
            dimension_semantics=("parallel", "arbitrary"),
            vmem_limit_bytes=56 * 1024 * 1024,  # safe on v7x (64 MiB physical)
        ),
    )(x2d, wgu, wd_t)

    if m_pad != M:
        out = out[:M]
    return out.reshape(B, S, H)


def make_mix_llama_mlp(w_gate, w_up, w_down, *, tm=256, ti=512,
                       compute_dtype=jnp.bfloat16):
    """Prepare fused/transposed weights ONCE and return a forward callable.

    w_gate, w_up: [I, H]   (nn.Linear layout)
    w_down:       [H, I]
    """
    I, H = w_gate.shape
    assert w_up.shape == (I, H) and w_down.shape == (H, I)
    assert H % 128 == 0 and I % 128 == 0, "H and I must be multiples of 128"

    ti = _pick_ti(I, ti)
    tm = max(16, (tm // 16) * 16)
    n_i = I // ti

    # Pre-transpose once (outside the hot path); interleave gate/up per I-tile
    # so each (H, 2*ti) weight block is [gate_tile_j | up_tile_j].
    wg_t = w_gate.T.astype(compute_dtype)            # (H, I)
    wu_t = w_up.T.astype(compute_dtype)              # (H, I)
    wgu = jnp.concatenate(
        [wg_t.reshape(H, n_i, ti), wu_t.reshape(H, n_i, ti)], axis=2,
    ).reshape(H, 2 * I)                              # (H, 2*I), tile-interleaved
    wd_t = w_down.T.astype(compute_dtype)            # (I, H)

    @jax.jit
    def forward(x):
        return _mlp_forward(x, wgu, wd_t, tm=tm, ti=ti)

    return forward


def _reference(x, w_gate, w_up, w_down):
    up = jnp.einsum("bsh,ih->bsi", x, w_up)
    gate = jnp.einsum("bsh,ih->bsi", x, w_gate)
    gate = gate * jax.nn.sigmoid(gate)
    h = gate * up
    return jnp.einsum("bsi,hi->bsh", h, w_down)


if __name__ == "__main__":
    B, S, H, I = 2, 8, 128, 256  # small shapes; H/I multiples of 128

    key = jax.random.PRNGKey(0)
    kx, kg, ku, kd = jax.random.split(key, 4)
    x = jax.random.normal(kx, (B, S, H), dtype=jnp.float32)
    w_gate = jax.random.normal(kg, (I, H), dtype=jnp.float32) * 0.05
    w_up = jax.random.normal(ku, (I, H), dtype=jnp.float32) * 0.05
    w_down = jax.random.normal(kd, (H, I), dtype=jnp.float32) * 0.05

    mlp = make_mix_llama_mlp(w_gate, w_up, w_down)
    y = jax.block_until_ready(mlp(x))

    y_ref = _reference(x, w_gate, w_up, w_down)
    assert y.shape == (B, S, H)
    # bf16 MXU inputs with f32 accumulation -> slightly looser tolerance vs f32 ref.
    assert jnp.allclose(y, y_ref, rtol=2e-2, atol=2e-2), "mismatch vs reference"

    print("KERNEL_OK")
</pallas_src>

<mosaic_0001>
module attributes {stable_mosaic.version = 11 : i64} {
  func.func @_mlp_kernel(%arg0: i32, %arg1: i32, %arg2: memref<16x128xbf16, #tpu.memory_space<vmem>>, %arg3: memref<128x512xbf16, #tpu.memory_space<vmem>>, %arg4: memref<256x128xbf16, #tpu.memory_space<vmem>>, %arg5: memref<16x128xf32, #tpu.memory_space<vmem>>, %arg6: memref<16x128xf32, #tpu.memory_space<vmem>>) attributes {dimension_semantics = [#tpu.dimension_semantics<parallel>, #tpu.dimension_semantics<arbitrary>], iteration_bounds = array<i64: 1, 1>, scalar_prefetch = 0 : i64, scratch_operands = 1 : i64, tpu.core_type = #tpu.core_type<tc>, window_params = [{transform_indices = @transform_0, window_bounds = array<i64: 16, 128>}, {transform_indices = @transform_1, window_bounds = array<i64: 128, 512>}, {transform_indices = @transform_2, window_bounds = array<i64: 256, 128>}, {transform_indices = @transform_3, window_bounds = array<i64: 16, 128>}]} {
    %c0_i32 = arith.constant 0 : i32
    %0 = arith.cmpi eq, %arg1, %c0_i32 : i32
    %1 = arith.extui %0 : i1 to i32
    %c0_i32_0 = arith.constant 0 : i32
    %2 = arith.cmpi ne, %1, %c0_i32_0 : i32
    scf.if %2 {
      %cst_14 = arith.constant 0.000000e+00 : f32
      %24 = vector.broadcast %cst_14 : f32 to vector<16x128xf32>
      %c0_15 = arith.constant 0 : index
      %c0_16 = arith.constant 0 : index
      %25 = vector.load %arg6[%c0_15, %c0_16] : memref<16x128xf32, #tpu.memory_space<vmem>>, vector<16x128xf32>
      tpu.vector_store %arg6[%c0_15, %c0_16], %24 {strides = array<i32>} : memref<16x128xf32, #tpu.memory_space<vmem>>, vector<16x128xf32>,
    } else {
    }
    %c0 = arith.constant 0 : index
    %c0_1 = arith.constant 0 : index
    %3 = vector.load %arg2[%c0, %c0_1] : memref<16x128xbf16, #tpu.memory_space<vmem>>, vector<16x128xbf16>
    %c0_2 = arith.constant 0 : index
    %c0_3 = arith.constant 0 : index
    %4 = vector.load %arg3[%c0_2, %c0_3] : memref<128x512xbf16, #tpu.memory_space<vmem>>, vector<128x512xbf16>
    %cst = arith.constant dense<0.000000e+00> : vector<16x512xf32>
    %5 = tpu.matmul %3, %4, %cst {dimension_numbers = #tpu.dot_dimension_numbers<[1], [0], [0], [1], [0, 0, 1, 1], [], []>} : vector<16x128xbf16>, vector<128x512xbf16>, vector<16x512xf32> -> vector<16x512xf32>
    %6 = vector.extract_strided_slice %5 {offsets = [0, 0], sizes = [16, 256], strides = [1, 1]} : vector<16x512xf32> to vector<16x256xf32>
    %7 = vector.extract_strided_slice %5 {offsets = [0, 256], sizes = [16, 256], strides = [1, 1]} : vector<16x512xf32> to vector<16x256xf32>
    %8 = arith.negf %6 : vector<16x256xf32>
    %9 = math.exp %8 : vector<16x256xf32>
    %cst_4 = arith.constant 1.000000e+00 : f32
    %10 = vector.broadcast %cst_4 : f32 to vector<16x256xf32>
    %11 = arith.addf %10, %9 : vector<16x256xf32>
    %12 = arith.divf %10, %11 : vector<16x256xf32>
    %13 = arith.mulf %6, %12 : vector<16x256xf32>
    %14 = arith.mulf %13, %7 : vector<16x256xf32>
    %c0_5 = arith.constant 0 : index
    %c0_6 = arith.constant 0 : index
    %15 = vector.load %arg6[%c0_5, %c0_6] : memref<16x128xf32, #tpu.memory_space<vmem>>, vector<16x128xf32>
    %16 = arith.truncf %14 : vector<16x256xf32> to vector<16x256xbf16>
    %c0_7 = arith.constant 0 : index
    %c0_8 = arith.constant 0 : index
    %17 = vector.load %arg4[%c0_7, %c0_8] : memref<256x128xbf16, #tpu.memory_space<vmem>>, vector<256x128xbf16>
    %cst_9 = arith.constant dense<0.000000e+00> : vector<16x128xf32>
    %18 = tpu.matmul %16, %17, %cst_9 {dimension_numbers = #tpu.dot_dimension_numbers<[1], [0], [0], [1], [0, 0, 1, 1], [], []>} : vector<16x256xbf16>, vector<256x128xbf16>, vector<16x128xf32> -> vector<16x128xf32>
    %19 = arith.addf %15, %18 : vector<16x128xf32>
    %c0_10 = arith.constant 0 : index
    %c0_11 = arith.constant 0 : index
    %20 = vector.load %arg6[%c0_10, %c0_11] : memref<16x128xf32, #tpu.memory_space<vmem>>, vector<16x128xf32>
    tpu.vector_store %arg6[%c0_10, %c0_11], %19 {strides = array<i32>} : memref<16x128xf32, #tpu.memory_space<vmem>>, vector<16x128xf32>,
    %c0_i32_12 = arith.constant 0 : i32
    %21 = arith.cmpi eq, %arg1, %c0_i32_12 : i32
    %22 = arith.extui %21 : i1 to i32
    %c0_i32_13 = arith.constant 0 : i32
    %23 = arith.cmpi ne, %22, %c0_i32_13 : i32
    scf.if %23 {
      %c0_14 = arith.constant 0 : index
      %c0_15 = arith.constant 0 : index
      %24 = vector.load %arg6[%c0_14, %c0_15] : memref<16x128xf32, #tpu.memory_space<vmem>>, vector<16x128xf32>
      %c0_16 = arith.constant 0 : index
      %c0_17 = arith.constant 0 : index
      %25 = vector.load %arg5[%c0_16, %c0_17] : memref<16x128xf32, #tpu.memory_space<vmem>>, vector<16x128xf32>
      tpu.vector_store %arg5[%c0_16, %c0_17], %24 {strides = array<i32>} : memref<16x128xf32, #tpu.memory_space<vmem>>, vector<16x128xf32>,
    } else {
    }
    return
  }
  func.func @transform_0(%arg0: i32, %arg1: i32) -> (i32, i32) {
    %c0_i32 = arith.constant 0 : i32
    %c0_i32_0 = arith.constant 0 : i32
    return %arg0, %c0_i32 : i32, i32
  }
  func.func @transform_1(%arg0: i32, %arg1: i32) -> (i32, i32) {
    %c0_i32 = arith.constant 0 : i32
    %c0_i32_0 = arith.constant 0 : i32
    return %c0_i32, %arg1 : i32, i32
  }
  func.func @transform_2(%arg0: i32, %arg1: i32) -> (i32, i32) {
    %c0_i32 = arith.constant 0 : i32
    %c0_i32_0 = arith.constant 0 : i32
    return %arg1, %c0_i32 : i32, i32
  }
  func.func @transform_3(%arg0: i32, %arg1: i32) -> (i32, i32) {
    %c0_i32 = arith.constant 0 : i32
    %c0_i32_0 = arith.constant 0 : i32
    return %arg0, %c0_i32 : i32, i32
  }
}

</mosaic_0001>

<bundles_post_ra>
// kernel: forward.1
= control target key start
LH: loop header
LB: loop body
LE: loop exit
PB: predicated region body
PF: predicated region fallthrough
CT: control target
= control target key end

     0   :  { %8 = vsyncpa [#allocation4], 0  ;;  %s1005_s0 = inlined_call_operand.vmem [shape: bf16[16,128], index: 0, kind: input, shape index: {}]   ;;  %s1006_s1 = inlined_call_operand.hbm [shape: bf16[128,512], index: 1, kind: input, shape index: {}]   ;;  %s1007_s2 = inlined_call_operand.hbm [shape: bf16[256,128], index: 2, kind: input, shape index: {}]   ;;  %s1008_s3 = inlined_call_operand.hbm [shape: f32[16,128], index: 3, kind: output, shape index: {}]  }
   0x1   :  { %9 = vsyncpa [#allocation7], 0 }
   0x2   :  { %10 = vsyncpa [#allocation5], 0  ;;  %s17_s14 = sshll.u32 %s1006_s1, 4  ;;  %s936_s15 = smov [#allocation3]   ;;  %s18_s14 = int_to_ptr.hbm [resolvable:$true] %s17_s14 }
   0x3   :  { %s19_s16 = sshll.u32 %s936_s15, 4  ;;  %s30_s19 = sshll.u32 %s1007_s2, 4  ;;  %s20_s16 = int_to_ptr.vmem [resolvable:$true] %s19_s16  ;;  %s31_s19 = int_to_ptr.hbm [resolvable:$true] %s30_s19 }
   0x4   :  { %s937_s20 = smov 256   ;;  %s938_s21 = smov 16  }
   0x5   :  { %25 = dma.hbm_to_vmem [thread:$0]  %s18_s14, 4096, %s20_s16, [#allocation4], %s937_s20, %s937_s20, %s938_s21  }
   0x6   :  { %s939_s22 = smov [#allocation6]   ;;  %s940_s24 = smov 64  }
   0x7   :  { %s32_s23 = sshll.u32 %s939_s22, 4  ;;  %s941_s25 = smov 4   ;;  %s33_s23 = int_to_ptr.vmem [resolvable:$true] %s32_s23 }
   0x8   :  { %38 = dma.hbm_to_vmem [thread:$0]  %s31_s19, 2048, %s33_s23, [#allocation7], %s940_s24, %s940_s24, %s941_s25  }
   0x9   :  { %930 = dma.done.wait [#allocation4], 4096  }
   0xa   :  { %931 = vsyncadd [#allocation4], 4294963200 }
   0xb   :  { %932 = dma.done.wait [#allocation7], 2048  }
   0xc   :  { %933 = vsyncadd [#allocation7], 4294965248  ;;  %v702_v0 = vld [vmem:[#allocation3 + $0xe0] sm:$0xf]  ;;  %v815_v1 = vld [vmem:[#allocation3 + $0xec] sm:$0xf0] }
   0xd   :  { %v813_v2 = vld [vmem:[#allocation3 + $0xe4] sm:$0xf]  ;;  %v703_v3 = vor.u32 %v815_v1, %v702_v0  ;;  %v704_v4 = vld [vmem:[#allocation3 + $0xf0] sm:$0xf0]  ;;  %v686_v5 = vld [vmem:[#allocation3 + $0xc0] sm:$0xf] }
   0xe   :  { %v811_v6 = vld [vmem:[#allocation3 + $0xcc] sm:$0xf0]  ;;  %v707_v7 = vor.u32 %v813_v2, %v704_v4  ;;  %v809_v8 = vld [vmem:[#allocation3 + $0xc4] sm:$0xf]  ;;  %v688_v9 = vld [vmem:[#allocation3 + $0xd0] sm:$0xf0] }
   0xf   :  { %253 = vmatpush.bf16.msra.mxu0 %v703_v3  ;;  %v687_v10 = vor.u32 %v811_v6, %v686_v5  ;;  %v691_v11 = vor.u32 %v809_v8, %v688_v9  ;;  %v670_v12 = vld [vmem:[#allocation3 + $0xa0] sm:$0xf]  ;;  %v807_v13 = vld [vmem:[#allocation3 + $0xac] sm:$0xf0]  ;;  %v805_v14 = vld [vmem:[#allocation3 + $0xa4] sm:$0xf] }
  0x10   :  { %267 = vmatpush.bf16.msra.mxu1 %v707_v7  ;;  %v672_v15 = vld [vmem:[#allocation3 + $0xb0] sm:$0xf0]  ;;  %v710_v16 = vld [vmem:[#allocation3 + $0xe8] sm:$0xf]  ;;  %v671_v17 = vor.u32 %v807_v13, %v670_v12  ;;  %v816_v18 = vld [vmem:[#allocation3 + $0xf4] sm:$0xf0] }
  0x11   :  { %v814_v19 = vld [vmem:[#allocation3 + $0xec] sm:$0xf]  ;;  %v712_v20 = vld [vmem:[#allocation3 + $0xf8] sm:$0xf0]  ;;  %v675_v21 = vor.u32 %v805_v14, %v672_v15  ;;  %v654_v22 = vld [vmem:[#allocation3 + $0x80] sm:$0xf]  ;;  %v711_v25 = vor.u32 %v816_v18, %v710_v16 }
  0x12   :  { %v803_v23 = vld [vmem:[#allocation3 + $0x8c] sm:$0xf0]  ;;  %v801_v24 = vld [vmem:[#allocation3 + $0x84] sm:$0xf]  ;;  %v715_v26 = vor.u32 %v814_v19, %v712_v20  ;;  %v656_v27 = vld [vmem:[#allocation3 + $0x90] sm:$0xf0] }
  0x13   :  { %254 = vmatpush.bf16.msra.mxu0 %v687_v10  ;;  %v694_v28 = vld [vmem:[#allocation3 + $0xc8] sm:$0xf]  ;;  %v812_v29 = vld [vmem:[#allocation3 + $0xd4] sm:$0xf0]  ;;  %281 = vmatpush.bf16.msra.mxu2 %v711_v25  ;;  %v810_v31 = vld [vmem:[#allocation3 + $0xcc] sm:$0xf]  ;;  %v655_v33 = vor.u32 %v803_v23, %v654_v22  ;;  %v659_v37 = vor.u32 %v801_v24, %v656_v27 }
  0x14   :  { %268 = vmatpush.bf16.msra.mxu1 %v691_v11  ;;  %295 = vmatpush.bf16.msra.mxu3 %v715_v26  ;;  %v695_v30 = vor.u32 %v812_v29, %v694_v28  ;;  %v696_v32 = vld [vmem:[#allocation3 + $0xd8] sm:$0xf0]  ;;  %v638_v34 = vld [vmem:[#allocation3 + $0x60] sm:$0xf]  ;;  %v799_v35 = vld [vmem:[#allocation3 + $0x6c] sm:$0xf0] }
  0x15   :  { %v699_v36 = vor.u32 %v810_v31, %v696_v32  ;;  %v678_v38 = vld [vmem:[#allocation3 + $0xa8] sm:$0xf]  ;;  %v808_v39 = vld [vmem:[#allocation3 + $0xb4] sm:$0xf0]  ;;  %v806_v40 = vld [vmem:[#allocation3 + $0xac] sm:$0xf]  ;;  %v639_v47 = vor.u32 %v799_v35, %v638_v34 }
  0x16   :  { %v797_v41 = vld [vmem:[#allocation3 + $0x64] sm:$0xf]  ;;  %v640_v42 = vld [vmem:[#allocation3 + $0x70] sm:$0xf0]  ;;  %v680_v43 = vld [vmem:[#allocation3 + $0xb8] sm:$0xf0]  ;;  %v679_v44 = vor.u32 %v808_v39, %v678_v38 }
  0x17   :  { %255 = vmatpush.bf16.msra.mxu0 %v671_v17  ;;  %282 = vmatpush.bf16.msra.mxu2 %v695_v30  ;;  %v683_v45 = vor.u32 %v806_v40, %v680_v43  ;;  %v662_v46 = vld [vmem:[#allocation3 + $0x88] sm:$0xf]  ;;  %v804_v48 = vld [vmem:[#allocation3 + $0x94] sm:$0xf0]  ;;  %v802_v49 = vld [vmem:[#allocation3 + $0x8c] sm:$0xf]  ;;  %v643_v51 = vor.u32 %v797_v41, %v640_v42 }
  0x18   :  { %269 = vmatpush.bf16.msra.mxu1 %v675_v21  ;;  %296 = vmatpush.bf16.msra.mxu3 %v699_v36  ;;  %v664_v50 = vld [vmem:[#allocation3 + $0x98] sm:$0xf0]  ;;  %v622_v52 = vld [vmem:[#allocation3 + $0x40] sm:$0xf]  ;;  %v795_v53 = vld [vmem:[#allocation3 + $0x4c] sm:$0xf0]  ;;  %v663_v56 = vor.u32 %v804_v48, %v662_v46 }
  0x19   :  { %v793_v54 = vld [vmem:[#allocation3 + $0x44] sm:$0xf]  ;;  %v624_v55 = vld [vmem:[#allocation3 + $0x50] sm:$0xf0]  ;;  %v667_v57 = vor.u32 %v802_v49, %v664_v50  ;;  %v646_v58 = vld [vmem:[#allocation3 + $0x68] sm:$0xf]  ;;  %v623_v59 = vor.u32 %v795_v53, %v622_v52 }
  0x1a   :  { %v800_v60 = vld [vmem:[#allocation3 + $0x74] sm:$0xf0]  ;;  %v798_v61 = vld [vmem:[#allocation3 + $0x6c] sm:$0xf]  ;;  %v648_v62 = vld [vmem:[#allocation3 + $0x78] sm:$0xf0]  ;;  %v627_v63 = vor.u32 %v793_v54, %v624_v55 }
  0x1b   :  { %256 = vmatpush.bf16.msra.mxu0 %v655_v33  ;;  %283 = vmatpush.bf16.msra.mxu2 %v679_v44  ;;  %v606_v0 = vld [vmem:[#allocation3 + $0x20] sm:$0xf]  ;;  %v791_v1 = vld [vmem:[#allocation3 + $0x2c] sm:$0xf0]  ;;  %v789_v2 = vld [vmem:[#allocation3 + $0x24] sm:$0xf]  ;;  %v647_v4 = vor.u32 %v800_v60, %v646_v58  ;;  %v651_v5 = vor.u32 %v798_v61, %v648_v62 }
  0x1c   :  { %270 = vmatpush.bf16.msra.mxu1 %v659_v37  ;;  %297 = vmatpush.bf16.msra.mxu3 %v683_v45  ;;  %v608_v3 = vld [vmem:[#allocation3 + $0x30] sm:$0xf0]  ;;  %v630_v6 = vld [vmem:[#allocation3 + $0x48] sm:$0xf]  ;;  %v607_v7 = vor.u32 %v791_v1, %v606_v0  ;;  %v796_v8 = vld [vmem:[#allocation3 + $0x54] sm:$0xf0] }
  0x1d   :  { %v794_v9 = vld [vmem:[#allocation3 + $0x4c] sm:$0xf]  ;;  %v632_v10 = vld [vmem:[#allocation3 + $0x58] sm:$0xf0]  ;;  %v611_v11 = vor.u32 %v789_v2, %v608_v3  ;;  %v590_v12 = vld [vmem:[#allocation3] sm:$0xf]  ;;  %v631_v16 = vor.u32 %v796_v8, %v630_v6 }
  0x1e   :  { %v787_v13 = vld [vmem:[#allocation3 + $0xc] sm:$0xf0]  ;;  %v785_v14 = vld [vmem:[#allocation3 + $0x4] sm:$0xf]  ;;  %v592_v15 = vld [vmem:[#allocation3 + $0x10] sm:$0xf0]  ;;  %v635_v17 = vor.u32 %v794_v9, %v632_v10 }
  0x1f   :  { %257 = vmatpush.bf16.msra.mxu0 %v639_v47  ;;  %284 = vmatpush.bf16.msra.mxu2 %v663_v56  ;;  %v591_v18 = vor.u32 %v787_v13, %v590_v12  ;;  %v614_v19 = vld [vmem:[#allocation3 + $0x28] sm:$0xf]  ;;  %v792_v20 = vld [vmem:[#allocation3 + $0x34] sm:$0xf0]  ;;  %v595_v21 = vor.u32 %v785_v14, %v592_v15  ;;  %v790_v22 = vld [vmem:[#allocation3 + $0x2c] sm:$0xf] }
  0x20   :  { %271 = vmatpush.bf16.msra.mxu1 %v643_v51  ;;  %298 = vmatpush.bf16.msra.mxu3 %v667_v57  ;;  %v616_v23 = vld [vmem:[#allocation3 + $0x38] sm:$0xf0]  ;;  %v784_v24 = vld [vmem:[%s1005_s0] sm:$0xff]  ;;  %v615_v25 = vor.u32 %v792_v20, %v614_v19  ;;  %v598_v27 = vld [vmem:[#allocation3 + $0x8] sm:$0xf]  ;;  %s942_s0 = smov [#allocation8]  }
  0x21   :  { %v619_v26 = vor.u32 %v790_v22, %v616_v23  ;;  %v788_v28 = vld [vmem:[#allocation3 + $0x14] sm:$0xf0]  ;;  %v786_v29 = vld [vmem:[#allocation3 + $0xc] sm:$0xf]  ;;  %v600_v30 = vld [vmem:[#allocation3 + $0x18] sm:$0xf0] }
  0x22   :  { %v599_v31 = vor.u32 %v788_v28, %v598_v27  ;;  %v603_v32 = vor.u32 %v786_v29, %v600_v30  ;;  %v824_v33 = vld [vmem:[#allocation6 + $0x38] sm:$0xff]  ;;  %v823_v35 = vld [vmem:[#allocation6 + $0x30] sm:$0xff]  ;;  %v822_v37 = vld [vmem:[#allocation6 + $0x28] sm:$0xff]  ;;  %s568_s26 = sshll.u32 %s942_s0, 4  ;;  %s570_s29 = sshll.u32 %s1008_s3, 4  ;;  %s569_s26 = int_to_ptr.vmem [resolvable:$true] %s568_s26  ;;  %s571_s29 = int_to_ptr.hbm [resolvable:$true] %s570_s29 }
  0x23   :  { %258 = vmatpush.bf16.msra.mxu0 %v623_v59  ;;  %285 = vmatpush.bf16.msra.mxu2 %v647_v4  ;;  %v832_v34 = vld [vmem:[#allocation6 + $0x78] sm:$0xff]  ;;  %v831_v36 = vld [vmem:[#allocation6 + $0x70] sm:$0xff]  ;;  %v830_v38 = vld [vmem:[#allocation6 + $0x68] sm:$0xff]  ;;  %s943_s30 = smov 128   ;;  %s944_s4 = smov 8  }
  0x24   :  { %272 = vmatpush.bf16.msra.mxu1 %v627_v63  ;;  %299 = vmatpush.bf16.msra.mxu3 %v651_v5  ;;  %v821_v39 = vld [vmem:[#allocation6 + $0x20] sm:$0xff]  ;;  %v820_v41 = vld [vmem:[#allocation6 + $0x18] sm:$0xff]  ;;  %v819_v47 = vld [vmem:[#allocation6 + $0x10] sm:$0xff] }
  0x25   :  { %v829_v40 = vld [vmem:[#allocation6 + $0x60] sm:$0xff]  ;;  %v828_v42 = vld [vmem:[#allocation6 + $0x58] sm:$0xff]  ;;  %v827_v48 = vld [vmem:[#allocation6 + $0x50] sm:$0xff] }
  0x26   :  { %v818_v49 = vld [vmem:[#allocation6 + $0x8] sm:$0xff]  ;;  %v817_v58 = vld [vmem:[#allocation6] sm:$0xff] }
  0x27   :  { %259 = vmatpush.bf16.msra.mxu0 %v607_v7  ;;  %286 = vmatpush.bf16.msra.mxu2 %v631_v16  ;;  %v826_v50 = vld [vmem:[#allocation6 + $0x48] sm:$0xff]  ;;  %v825_v59 = vld [vmem:[#allocation6 + $0x40] sm:$0xff] }
  0x28   :  { %273 = vmatpush.bf16.msra.mxu1 %v611_v11  ;;  %300 = vmatpush.bf16.msra.mxu3 %v635_v17 }
  0x2b   :  { %260 = vmatpush.bf16.msra.mxu0 %v591_v18  ;;  %287 = vmatpush.bf16.msra.mxu2 %v615_v25 }
  0x2c   :  { %274 = vmatpush.bf16.msra.mxu1 %v595_v21  ;;  %301 = vmatpush.bf16.msra.mxu3 %v619_v26 }
  0x2e   :  { %261 = vmatmul.bf16.vlgmr.msra.gmra.mxu0 %v784_v24 }
  0x2f   :  { %275 = vmatmul.bf16.vlgmr.msra.gmra.mxu1 %v784_v24  ;;  %288 = vmatpush.bf16.msra.mxu2 %v599_v31 }
  0x30   :  { %302 = vmatpush.bf16.msra.mxu3 %v603_v32  ;;  %525 = vmatpush.bf16.msrb.mxu0 %v824_v33 }
  0x31   :  { %539 = vmatpush.bf16.msrb.mxu1 %v832_v34 }
  0x32   :  { %289 = vmatmul.bf16.vlgmr.msra.gmra.mxu2 %v784_v24 }
  0x33   :  { %303 = vmatmul.bf16.vlgmr.msra.gmra.mxu3 %v784_v24 }
  0x34   :  { %526 = vmatpush.bf16.msrb.mxu0 %v823_v35 }
  0x35   :  { %540 = vmatpush.bf16.msrb.mxu1 %v831_v36 }
  0x38   :  { %527 = vmatpush.bf16.msrb.mxu0 %v822_v37 }
  0x39   :  { %541 = vmatpush.bf16.msrb.mxu1 %v830_v38 }
  0x3c   :  { %528 = vmatpush.bf16.msrb.mxu0 %v821_v39 }
  0x3d   :  { %542 = vmatpush.bf16.msrb.mxu1 %v829_v40 }
  0x40   :  { %529 = vmatpush.bf16.msrb.mxu0 %v820_v41 }
  0x41   :  { %543 = vmatpush.bf16.msrb.mxu1 %v828_v42 }
  0x44   :  { %530 = vmatpush.bf16.msrb.mxu0 %v819_v47 }
  0x45   :  { %544 = vmatpush.bf16.msrb.mxu1 %v827_v48 }
  0x48   :  { %531 = vmatpush.bf16.msrb.mxu0 %v818_v49 }
  0x49   :  { %545 = vmatpush.bf16.msrb.mxu1 %v826_v50 }
  0x4c   :  { %532 = vmatpush.bf16.msrb.mxu0 %v817_v58 }
  0x4d   :  { %546 = vmatpush.bf16.msrb.mxu1 %v825_v59 }
  0xab   :  { %v974_v43 = vpop.f32.mrf.mxu0 }
  0xac   :  { %v716_v44 = vmul.f32 -1.442695, %v974_v43  ;;  %v977_v45 = vpop.f32.mrf.mxu1 }
  0xad   :  { %v717_v46 = vmul.f32 -1.442695, %v977_v45 }
  0xae   :  { %842 = vpow2.f32 %v716_v44 }
  0xaf   :  { %844 = vpow2.f32 %v717_v46 }
  0xb3   :  { %v980_v51 = vpop.f32.mrf.mxu0 }
  0xb4   :  { %v843_v52 = vpop.eup %842  ;;  %v718_v53 = vmul.f32 -1.442695, %v980_v51  ;;  %v983_v54 = vpop.f32.mrf.mxu1 }
  0xb5   :  { %v845_v55 = vpop.eup %844  ;;  %v321_v56 = vadd.f32 1.0, %v843_v52  ;;  %v719_v57 = vmul.f32 -1.442695, %v983_v54  ;;  %v290_v17 = vpop.f32.mrf.mxu2 }
  0xb6   :  { %v322_v60 = vadd.f32 1.0, %v845_v55  ;;  %846 = vpow2.f32 %v718_v53  ;;  %v304_v28 = vpop.f32.mrf.mxu3 }
  0xb7   :  { %848 = vrcp.f32 %v321_v56  ;;  %v336_v11 = vand.u32 2147483648, %v321_v56  ;;  %vm330_vm1 = vweird.f32 %v321_v56  ;;  %v334_v12 = vand.u32 2147483647, %v321_v56 }
  0xb8   :  { %850 = vrcp.f32 %v322_v60  ;;  %v349_v16 = vand.u32 2147483647, %v322_v60  ;;  %v351_v20 = vand.u32 2147483648, %v322_v60  ;;  %vm345_vm4 = vweird.f32 %v322_v60 }
  0xb9   :  { %852 = vpow2.f32 %v719_v57  ;;  %v337_v22 = vor.u32 1.1754944e-38, %v336_v11  ;;  %vm335_vm5 = vcmp.eq.f32.partialorder %v334_v12, 8.507059e+37 }
  0xba   :  { %vm350_vm8 = vcmp.eq.f32.partialorder %v349_v16, 8.507059e+37  ;;  %v352_v32 = vor.u32 1.1754944e-38, %v351_v20 }
  0xbc   :  { %v847_v61 = vpop.eup %846 }
  0xbd   :  { %v849_v62 = vpop.eup %848  ;;  %v323_v63 = vadd.f32 1.0, %v847_v61  ;;  %v292_v49 = vpop.f32.mrf.mxu2 }
  0xbe   :  { %v851_v0 = vpop.eup %850  ;;  %v326_v1 = vmul.f32 %v849_v62, %v321_v56  ;;  %vm331_vm0 = vweird.f32 %v849_v62  ;;  %v306_v56 = vpop.f32.mrf.mxu3 }
  0xbf   :  { %v853_v2 = vpop.eup %852  ;;  %v341_v3 = vmul.f32 %v851_v0, %v322_v60  ;;  %854 = vrcp.f32 %v323_v63  ;;  %vm986_vm2 = vmor %vm330_vm1, %vm331_vm0  ;;  %vm346_vm3 = vweird.f32 %v851_v0  ;;  %v366_v23 = vand.u32 2147483648, %v323_v63 }
  0xc0   :  { %v327_v4 = vsub.f32 1.0, %v326_v1  ;;  %v324_v5 = vadd.f32 1.0, %v853_v2  ;;  %vm992_vm6 = vmor %vm345_vm4, %vm346_vm3  ;;  %v364_v27 = vand.u32 2147483647, %v323_v63  ;;  %vm360_vm9 = vweird.f32 %v323_v63 }
  0xc1   :  { %v342_v6 = vsub.f32 1.0, %v341_v3  ;;  %v367_v35 = vor.u32 1.1754944e-38, %v366_v23 }
  0xc2   :  { %v328_v7 = vmul.f32 %v849_v62, %v327_v4  ;;  %856 = vrcp.f32 %v324_v5  ;;  %v381_v34 = vand.u32 2147483648, %v324_v5  ;;  %v379_v37 = vand.u32 2147483647, %v324_v5 }
  0xc3   :  { %v343_v8 = vmul.f32 %v851_v0, %v342_v6  ;;  %vm365_vm12 = vcmp.eq.f32.partialorder %v364_v27, 8.507059e+37  ;;  %vm375_vm13 = vweird.f32 %v324_v5 }
  0xc4   :  { %v329_v9 = vadd.f32 %v849_v62, %v328_v7  ;;  %v382_v46 = vor.u32 1.1754944e-38, %v381_v34  ;;  %vm380_vm15 = vcmp.eq.f32.partialorder %v379_v37, 8.507059e+37 }
  0xc5   :  { %v855_v10 = vpop.eup %854  ;;  %v344_v15 = vadd.f32 %v851_v0, %v343_v8 }
  0xc6   :  { %v356_v13 = vmul.f32 %v855_v10, %v323_v63  ;;  %v333_v19 = vsel %vm986_vm2, %v849_v62, %v329_v9  ;;  %vm361_vm7 = vweird.f32 %v855_v10 }
  0xc7   :  { %v338_v29 = vsel %vm335_vm5, %v337_v22, %v333_v19  ;;  %v348_v30 = vsel %vm992_vm6, %v851_v0, %v344_v15  ;;  %vm362_vm10 = vmor %vm360_vm9, %vm361_vm7 }
  0xc8   :  { %v857_v18 = vpop.eup %856  ;;  %v357_v21 = vsub.f32 1.0, %v356_v13  ;;  %v385_v38 = vmul.f32 %v338_v29, %v974_v43  ;;  %v353_v39 = vsel %vm350_vm8, %v352_v32, %v348_v30 }
  0xc9   :  { %v371_v24 = vmul.f32 %v857_v18, %v324_v5  ;;  %vm376_vm11 = vweird.f32 %v857_v18  ;;  %v386_v47 = vmul.f32 %v353_v39, %v977_v45 }
  0xca   :  { %v358_v26 = vmul.f32 %v855_v10, %v357_v21  ;;  %vm377_vm14 = vmor %vm375_vm13, %vm376_vm11  ;;  %v389_v52 = vmul.f32 %v385_v38, %v290_v17 }
  0xcb   :  { %v372_v31 = vsub.f32 1.0, %v371_v24  ;;  %v390_v57 = vmul.f32 %v386_v47, %v304_v28 }
  0xcc   :  { %v359_v33 = vadd.f32 %v855_v10, %v358_v26 }
  0xcd   :  { %v373_v36 = vmul.f32 %v857_v18, %v372_v31 }
  0xce   :  { %v363_v40 = vsel %vm362_vm10, %v855_v10, %v359_v33 }
  0xcf   :  { %v368_v41 = vsel %vm365_vm12, %v367_v35, %v363_v40  ;;  %v374_v42 = vadd.f32 %v857_v18, %v373_v36 }
  0xd0   :  { %v387_v44 = vmul.f32 %v368_v41, %v980_v51 }
  0xd1   :  { %v378_v48 = vsel %vm377_vm14, %v857_v18, %v374_v42 }
  0xd2   :  { %v383_v50 = vsel %vm380_vm15, %v382_v46, %v378_v48  ;;  %v391_v53 = vmul.f32 %v387_v44, %v292_v49 }
  0xd3   :  { %v388_v43 = vmul.f32 %v383_v50, %v983_v54 }
  0xd4   :  { %v395_v55 = vpack.c.bf16 %v391_v53, %v389_v52 }
  0xd5   :  { %v392_v58 = vmul.f32 %v388_v43, %v306_v56 }
  0xd6   :  { %533 = vmatmul.bf16.vlgmr.msrb.gmra.mxu0 %v395_v55 }
  0xd7   :  { %v396_v59 = vpack.c.bf16 %v392_v58, %v390_v57 }
  0xd9   :  { %547 = vmatmul.bf16.vlgmr.msrb.gmra.mxu1 %v396_v59 }
 0x153   :  { %v534_v51 = vpop.f32.mrf.mxu0 }
 0x156   :  { %v548_v60 = vpop.f32.mrf.mxu1 }
 0x157   :  { %v549_v61 = vadd.f32 %v548_v60, %v534_v51 }
 0x159   :  { %562 = vst [vmem:[#allocation8] sm:$0xff] %v549_v61 }
 0x15b   :  { %v536_v45 = vpop.f32.mrf.mxu0 }
 0x15e   :  { %v550_v62 = vpop.f32.mrf.mxu1 }
 0x15f   :  { %v551_v54 = vadd.f32 %v550_v62, %v536_v45 }
 0x161   :  { %563 = vst [vmem:[#allocation8 + $0x8] sm:$0xff] %v551_v54 }
 0x162   :  { %576 = dma.vmem_to_hbm [thread:$0]  %s569_s26, 256, %s571_s29, [#allocation5], %s943_s30, %s943_s30, %s944_s4  }
 0x163   :  { %934 = dma.done.wait [#allocation5], 256  }
 0x164   :  { %935 = vsyncadd [#allocation5], 4294967040 }
 0x165   :  { %581 = vsyncpa [#allocation4], 1 }
 0x166   :  { %582 = vsyncpa [#allocation7], 1 }
 0x167   :  { %583 = vsyncpa [#allocation5], 1 }

</bundles_post_ra>
